<compile_context>
chip_gen: v7x
topology: tpu7x:2x2x1
jax: 0.10.0
libtpu: 0.0.40
codegen_flags: <defaults>
</compile_context>

<pallas_src>
import jax
import jax.numpy as jnp
from jax.experimental import pallas as pl
from jax.experimental.pallas import tpu as pltpu


def _vae_sampler_kernel(mean_ref, logvar_ref, noise_ref, z_ref):
    # Compute in f32 regardless of input dtype, cast exactly once at the store.
    mean = mean_ref[...].astype(jnp.float32)
    logvar = logvar_ref[...].astype(jnp.float32)
    noise = noise_ref[...].astype(jnp.float32)
    std = jnp.exp(0.5 * logvar)          # EUP exp, elementwise
    z_ref[...] = (mean + std * noise).astype(z_ref.dtype)


def _round_up(x, m):
    return ((x + m - 1) // m) * m


def vae_sampler(mean, logvar, noise_key):
    """JAX/Pallas equivalent of VAESampler.forward(mean, logvar)."""
    assert mean.shape == logvar.shape
    assert mean.dtype == logvar.dtype
    orig_shape = mean.shape
    dtype = mean.dtype

    # randn_like: host/XLA-side standard-normal noise (bit-exact match with
    # torch's RNG is not expected, only the distribution).
    noise = jax.random.normal(noise_key, orig_shape, dtype=dtype)

    lanes = 128
    total = mean.size
    rows = pl.cdiv(total, lanes)

    # Tile rows: big enough to hit the HBM roofline (~0.5 MiB/buffer at f32),
    # multiple of 32 sublanes so packed (bf16/int8) layouts also stay unmasked.
    tm = 1024 if rows >= 1024 else _round_up(rows, 32)
    rows_padded = _round_up(rows, tm)
    padded_total = rows_padded * lanes

    def _to_slab(x):
        flat = x.reshape(-1)
        if padded_total != total:
            flat = jnp.pad(flat, (0, padded_total - total))
        return flat.reshape(rows_padded, lanes)

    mean2d = _to_slab(mean)
    logvar2d = _to_slab(logvar)
    noise2d = _to_slab(noise)

    grid = (rows_padded // tm,)
    block = pl.BlockSpec((tm, lanes), lambda i: (i, 0))

    itemsize = jnp.dtype(dtype).itemsize
    cost = pl.CostEstimate(
        flops=3 * total,                     # 0.5*logvar, std*noise, + mean
        transcendentals=total,               # the exp
        bytes_accessed=4 * total * itemsize, # 3 reads + 1 write
    )

    z2d = pl.pallas_call(
        _vae_sampler_kernel,
        out_shape=jax.ShapeDtypeStruct((rows_padded, lanes), dtype),
        grid=grid,
        in_specs=[block, block, block],
        out_specs=block,
        compiler_params=pltpu.CompilerParams(
            dimension_semantics=("parallel",),
        ),
        cost_estimate=cost,
    )(mean2d, logvar2d, noise2d)

    return z2d.reshape(-1)[:total].reshape(orig_shape)


if __name__ == "__main__":
    key = jax.random.PRNGKey(0)
    kmean, klogvar, knoise = jax.random.split(key, 3)

    # Small VAE-latent-like shapes: batch=2, channels=4, spatial=16x16 (NCHW).
    mean = jax.random.normal(kmean, (2, 4, 16, 16), dtype=jnp.float32)
    logvar = 0.1 * jax.random.normal(klogvar, (2, 4, 16, 16), dtype=jnp.float32)

    z = vae_sampler(mean, logvar, knoise)
    z = jax.block_until_ready(z)

    assert z.shape == mean.shape and z.dtype == mean.dtype
    # Sanity: z should be finite and (z - mean) / std should look ~N(0,1).
    std = jnp.exp(0.5 * logvar)
    eps = (z - mean) / std
    assert bool(jnp.all(jnp.isfinite(z)))
    assert abs(float(jnp.mean(eps))) < 0.2
    assert 0.7 < float(jnp.std(eps)) < 1.3
    # Exact check against the pure-JAX reference (same noise tensor).
    noise_ref = jax.random.normal(knoise, mean.shape, dtype=mean.dtype)
    z_ref = mean + std * noise_ref
    assert bool(jnp.allclose(z, z_ref, atol=1e-5, rtol=1e-5))

    print("KERNEL_OK")
</pallas_src>

<mosaic_0001>
module attributes {stable_mosaic.version = 11 : i64} {
  func.func @_vae_sampler_kernel(%arg0: i32, %arg1: memref<32x128xf32, #tpu.memory_space<vmem>>, %arg2: memref<32x128xf32, #tpu.memory_space<vmem>>, %arg3: memref<32x128xf32, #tpu.memory_space<vmem>>, %arg4: memref<32x128xf32, #tpu.memory_space<vmem>>) attributes {dimension_semantics = [#tpu.dimension_semantics<parallel>], iteration_bounds = array<i64: 1>, scalar_prefetch = 0 : i64, scratch_operands = 0 : i64, tpu.core_type = #tpu.core_type<tc>, window_params = [{transform_indices = @transform_0, window_bounds = array<i64: 32, 128>}, {transform_indices = @transform_1, window_bounds = array<i64: 32, 128>}, {transform_indices = @transform_2, window_bounds = array<i64: 32, 128>}, {transform_indices = @transform_3, window_bounds = array<i64: 32, 128>}]} {
    %c0 = arith.constant 0 : index
    %c0_0 = arith.constant 0 : index
    %0 = vector.load %arg1[%c0, %c0_0] : memref<32x128xf32, #tpu.memory_space<vmem>>, vector<32x128xf32>
    %c0_1 = arith.constant 0 : index
    %c0_2 = arith.constant 0 : index
    %1 = vector.load %arg2[%c0_1, %c0_2] : memref<32x128xf32, #tpu.memory_space<vmem>>, vector<32x128xf32>
    %c0_3 = arith.constant 0 : index
    %c0_4 = arith.constant 0 : index
    %2 = vector.load %arg3[%c0_3, %c0_4] : memref<32x128xf32, #tpu.memory_space<vmem>>, vector<32x128xf32>
    %cst = arith.constant 5.000000e-01 : f32
    %3 = vector.broadcast %cst : f32 to vector<32x128xf32>
    %4 = arith.mulf %3, %1 : vector<32x128xf32>
    %5 = math.exp %4 : vector<32x128xf32>
    %6 = arith.mulf %5, %2 : vector<32x128xf32>
    %7 = arith.addf %0, %6 : vector<32x128xf32>
    %c0_5 = arith.constant 0 : index
    %c0_6 = arith.constant 0 : index
    %8 = vector.load %arg4[%c0_5, %c0_6] : memref<32x128xf32, #tpu.memory_space<vmem>>, vector<32x128xf32>
    tpu.vector_store %arg4[%c0_5, %c0_6], %7 {strides = array<i32>} : memref<32x128xf32, #tpu.memory_space<vmem>>, vector<32x128xf32>,
    return
  }
  func.func @transform_0(%arg0: i32) -> (i32, i32) {
    %c0_i32 = arith.constant 0 : i32
    %c0_i32_0 = arith.constant 0 : i32
    return %arg0, %c0_i32 : i32, i32
  }
  func.func @transform_1(%arg0: i32) -> (i32, i32) {
    %c0_i32 = arith.constant 0 : i32
    %c0_i32_0 = arith.constant 0 : i32
    return %arg0, %c0_i32 : i32, i32
  }
  func.func @transform_2(%arg0: i32) -> (i32, i32) {
    %c0_i32 = arith.constant 0 : i32
    %c0_i32_0 = arith.constant 0 : i32
    return %arg0, %c0_i32 : i32, i32
  }
  func.func @transform_3(%arg0: i32) -> (i32, i32) {
    %c0_i32 = arith.constant 0 : i32
    %c0_i32_0 = arith.constant 0 : i32
    return %arg0, %c0_i32 : i32, i32
  }
}

</mosaic_0001>

<bundles_post_ra>
// kernel: tpu_custom_call.1
= control target key start
LH: loop header
LB: loop body
LE: loop exit
PB: predicated region body
PF: predicated region fallthrough
CT: control target
= control target key end

     0   :  { %8 = vsyncpa [#allocation3], 0  ;;  %s311_s0 = inlined_call_operand.hbm [shape: f32[32,128], index: 0, kind: input, shape index: {}]   ;;  %s312_s1 = inlined_call_operand.hbm [shape: f32[32,128], index: 1, kind: input, shape index: {}]   ;;  %s313_s2 = inlined_call_operand.hbm [shape: f32[32,128], index: 2, kind: input, shape index: {}]   ;;  %s314_s3 = inlined_call_operand.hbm [shape: f32[32,128], index: 3, kind: output, shape index: {}]  }
   0x1   :  { %9 = vsyncpa [#allocation6], 0 }
   0x2   :  { %10 = vsyncpa [#allocation4], 0  ;;  %s218_s12 = smov [#allocation5]   ;;  %s219_s14 = smov [#allocation2]  }
   0x3   :  { %s28_s13 = sshll.u32 %s218_s12, 4  ;;  %s16_s15 = sshll.u32 %s219_s14, 4  ;;  %s29_s13 = int_to_ptr.vmem [resolvable:$true] %s28_s13  ;;  %s244_s15 = int_to_ptr.vmem [resolvable:$true] %s16_s15 }
   0x4   :  { %s124_s18 = scalar_lea.hbm %s312_s1, 512 }
   0x5   :  { %p125_p0 = scmp.ne.s32.totalorder %s312_s1, %s124_s18  ;;  %p128_p1 = scmp.lt.u32.totalorder %s124_s18, %s312_s1 }
   0x7   :  { %p130_p2 = pnand %p128_p1, %p125_p0 }
   0x9   :  { %133 = shalt.err (!%p130_p2)
}
   0xa   :  { %s134_s23 = scalar_lea.vmem %s29_s13, 512  ;;  %p139_p4 = scmp.lt.s32.totalorder %s29_s13, %s29_s13 }
   0xb   :  { %p135_p3 = scmp.ne.s32.totalorder %s29_s13, %s134_s23  ;;  %p140_p5 = scmp.lt.s32.totalorder %s134_s23, %s134_s23 }
   0xd   :  { %p141_p6 = por %p140_p5, %p139_p4 }
   0xf   :  { %p142_p7 = pnand %p141_p6, %p135_p3 }
  0x11   :  { %145 = shalt.err (!%p142_p7)
}
  0x12   :  { %s220_s24 = smov 128   ;;  %s221_s25 = smov 8  }
  0x13   :  { %34 = dma.hbm_to_vmem [thread:$0]  %s312_s1, 512, %s29_s13, [#allocation6], %s220_s24, %s220_s24, %s221_s25  }
  0x14   :  { %s146_s30 = scalar_lea.hbm %s311_s0, 512 }
  0x15   :  { %p147_p8 = scmp.ne.s32.totalorder %s311_s0, %s146_s30  ;;  %p150_p9 = scmp.lt.u32.totalorder %s146_s30, %s311_s0 }
  0x17   :  { %p152_p10 = pnand %p150_p9, %p147_p8 }
  0x19   :  { %155 = shalt.err (!%p152_p10)
}
  0x1a   :  { %s156_s8 = scalar_lea.vmem %s244_s15, 512  ;;  %p161_p12 = scmp.lt.s32.totalorder %s244_s15, %s244_s15 }
  0x1b   :  { %p157_p11 = scmp.ne.s32.totalorder %s244_s15, %s156_s8  ;;  %p162_p13 = scmp.lt.s32.totalorder %s156_s8, %s156_s8 }
  0x1d   :  { %p163_p0 = por %p162_p13, %p161_p12 }
  0x1f   :  { %p164_p1 = pnand %p163_p0, %p157_p11 }
  0x21   :  { %167 = shalt.err (!%p164_p1)
}
  0x22   :  { %22 = dma.hbm_to_vmem [thread:$0]  %s311_s0, 512, %s244_s15, [#allocation3], %s220_s24, %s220_s24, %s221_s25  }
  0x23   :  { %s222_s10 = smov [#allocation7]   ;;  %s168_s14 = scalar_lea.hbm %s313_s2, 512 }
  0x24   :  { %s40_s11 = sshll.u32 %s222_s10, 4  ;;  %p169_p2 = scmp.ne.s32.totalorder %s313_s2, %s168_s14  ;;  %s41_s11 = int_to_ptr.vmem [resolvable:$true] %s40_s11 }
  0x25   :  { %p172_p3 = scmp.lt.u32.totalorder %s168_s14, %s313_s2 }
  0x27   :  { %p174_p4 = pnand %p172_p3, %p169_p2 }
  0x29   :  { %177 = shalt.err (!%p174_p4)
}
  0x2a   :  { %s178_s20 = scalar_lea.vmem %s41_s11, 512  ;;  %p183_p6 = scmp.lt.s32.totalorder %s41_s11, %s41_s11 }
  0x2b   :  { %p179_p5 = scmp.ne.s32.totalorder %s41_s11, %s178_s20  ;;  %p184_p7 = scmp.lt.s32.totalorder %s178_s20, %s178_s20 }
  0x2d   :  { %p185_p8 = por %p184_p7, %p183_p6 }
  0x2f   :  { %p186_p9 = pnand %p185_p8, %p179_p5 }
  0x31   :  { %189 = shalt.err (!%p186_p9)
}
  0x32   :  { %46 = dma.hbm_to_vmem [thread:$0]  %s313_s2, 512, %s41_s11, [#allocation6], %s220_s24, %s220_s24, %s221_s25  }
  0x33   :  { %212 = dma.done.wait [#allocation3], 512  }
  0x34   :  { %213 = vsyncadd [#allocation3], 4294966784 }
  0x35   :  { %214 = dma.done.wait [#allocation6], 1024  }
  0x36   :  { %215 = vsyncadd [#allocation6], 4294966272  ;;  %v60_v0 = vld [vmem:[#allocation5] sm:$0xff]  ;;  %v61_v2 = vld [vmem:[#allocation5 + $0x8] sm:$0xff]  ;;  %s223_s2 = smov [#allocation8]  }
  0x37   :  { %v68_v1 = vmul.f32 0.5, %v60_v0  ;;  %v69_v3 = vmul.f32 0.5, %v61_v2  ;;  %v62_v4 = vld [vmem:[#allocation5 + $0x10] sm:$0xff]  ;;  %v63_v7 = vld [vmem:[#allocation5 + $0x18] sm:$0xff]  ;;  %v64_v12 = vld [vmem:[#allocation7] sm:$0xff]  ;;  %s97_s21 = sshll.u32 %s223_s2, 4  ;;  %s98_s21 = int_to_ptr.vmem [resolvable:$true] %s97_s21 }
  0x38   :  { %v70_v6 = vmul.f32 0.5, %v62_v4  ;;  %v71_v9 = vmul.f32 0.5, %v63_v7  ;;  %v65_v13 = vld [vmem:[#allocation7 + $0x8] sm:$0xff]  ;;  %v56_v15 = vld [vmem:[#allocation2] sm:$0xff]  ;;  %v66_v16 = vld [vmem:[#allocation7 + $0x10] sm:$0xff]  ;;  %s190_s22 = scalar_lea.vmem %s98_s21, 512  ;;  %p195_p11 = scmp.lt.s32.totalorder %s98_s21, %s98_s21 }
  0x39   :  { %v72_v5 = vmul.f32 1.442695, %v68_v1  ;;  %v74_v8 = vmul.f32 1.442695, %v69_v3  ;;  %v57_v19 = vld [vmem:[#allocation2 + $0x8] sm:$0xff]  ;;  %v67_v20 = vld [vmem:[#allocation7 + $0x18] sm:$0xff]  ;;  %p191_p10 = scmp.ne.s32.totalorder %s98_s21, %s190_s22  ;;  %p196_p12 = scmp.lt.s32.totalorder %s190_s22, %s190_s22 }
  0x3a   :  { %v76_v10 = vmul.f32 1.442695, %v70_v6  ;;  %v78_v11 = vmul.f32 1.442695, %v71_v9  ;;  %v58_v23 = vld [vmem:[#allocation2 + $0x10] sm:$0xff]  ;;  %v59_v27 = vld [vmem:[#allocation2 + $0x18] sm:$0xff] }
  0x3b   :  { %116 = vpow2.f32 %v72_v5  ;;  %p197_p13 = por %p196_p12, %p195_p11 }
  0x3c   :  { %118 = vpow2.f32 %v74_v8 }
  0x3d   :  { %120 = vpow2.f32 %v76_v10  ;;  %p198_p0 = pnand %p197_p13, %p191_p10 }
  0x3e   :  { %122 = vpow2.f32 %v78_v11 }
  0x45   :  { %v117_v14 = vpop.eup %116 }
  0x46   :  { %v119_v17 = vpop.eup %118  ;;  %v80_v18 = vmul.f32 %v117_v14, %v64_v12 }
  0x47   :  { %v121_v21 = vpop.eup %120  ;;  %v81_v22 = vmul.f32 %v119_v17, %v65_v13 }
  0x48   :  { %v123_v24 = vpop.eup %122  ;;  %v84_v25 = vadd.f32 %v80_v18, %v56_v15  ;;  %v82_v26 = vmul.f32 %v121_v21, %v66_v16 }
  0x49   :  { %v85_v28 = vadd.f32 %v81_v22, %v57_v19  ;;  %v83_v29 = vmul.f32 %v123_v24, %v67_v20 }
  0x4a   :  { %88 = vst [vmem:[#allocation8] sm:$0xff] %v84_v25  ;;  %v86_v30 = vadd.f32 %v82_v26, %v58_v23 }
  0x4b   :  { %89 = vst [vmem:[#allocation8 + $0x8] sm:$0xff] %v85_v28  ;;  %v87_v31 = vadd.f32 %v83_v29, %v59_v27 }
  0x4c   :  { %90 = vst [vmem:[#allocation8 + $0x10] sm:$0xff] %v86_v30 }
  0x4d   :  { %91 = vst [vmem:[#allocation8 + $0x18] sm:$0xff] %v87_v31 }
  0x4e   :  { %201 = shalt.err (!%p198_p0)
}
  0x4f   :  { %s202_s27 = scalar_lea.hbm %s314_s3, 512 }
  0x50   :  { %p203_p1 = scmp.ne.s32.totalorder %s314_s3, %s202_s27  ;;  %p206_p2 = scmp.lt.u32.totalorder %s202_s27, %s314_s3 }
  0x52   :  { %p208_p3 = pnand %p206_p2, %p203_p1 }
  0x54   :  { %211 = shalt.err (!%p208_p3)
}
  0x55   :  { %103 = dma.vmem_to_hbm [thread:$0]  %s98_s21, 512, %s314_s3, [#allocation4], %s220_s24, %s220_s24, %s221_s25  }
  0x56   :  { %216 = dma.done.wait [#allocation4], 512  }
  0x57   :  { %217 = vsyncadd [#allocation4], 4294966784 }
  0x58   :  { %107 = vsyncpa [#allocation3], 1 }
  0x59   :  { %108 = vsyncpa [#allocation6], 1 }
  0x5a   :  { %109 = vsyncpa [#allocation4], 1 }

</bundles_post_ra>
